<compile_context>
chip_gen: v7x
topology: tpu7x:2x2x1
jax: 0.10.0
libtpu: 0.0.40
codegen_flags: <defaults>
</compile_context>

<pallas_src>
import functools

import jax
import jax.numpy as jnp
import numpy as np
from jax.experimental import pallas as pl
from jax.experimental.pallas import tpu as pltpu

EPS = 1e-5                              # PyTorch BatchNorm1d default eps
VMEM_LIMIT = 32 * 1024 * 1024           # explicit scoped-VMEM budget (all gens)
DEFAULT_N_TILE_CAP = 1024               # sweep 1024-2048 (v7x <= 2048)


# ----------------------------- Pallas kernels --------------------------------
def stn3d_pool_kernel(x_ref, w1, b1, w2, b2, w3, b3, g_ref, gmax,
                      *, n_total, n_tile):
    """Conv1(k=1)+BN+ReLU x3, then running max over points.

    x_ref: (C, n_tile)   one N-tile of one batch element, native NCW layout.
    w1: (C, 64)  f32, b1: (1, 64)    -> h1 = relu(xT @ w1 + b1)   (n_tile, 64)
    w2: (64,128) bf16, b2: (1, 128)  -> h2 = relu(h1 @ w2 + b2)   (n_tile, 128)
    w3: (128,1024) bf16, b3: (1,1024)-> h3 = relu(h2 @ w3 + b3)   (n_tile, 1024)
    gmax: (1, 1024) f32 scratch, running max across N-tiles.  Zero-init is
          valid ONLY because ReLU guarantees the true max is >= 0.
    g_ref: (1, 1024) pooled feature, written on the last N-tile (lane-dense).
    """
    nt = pl.program_id(1)

    @pl.when(nt == 0)
    def _():
        gmax[...] = jnp.zeros_like(gmax)

    # Transpose the 3-row x tile (cheap XLU work) instead of the 64-row h1 so
    # conv2/conv3 need no further transposes.
    xt = x_ref[...].T                                            # (n_tile, C)
    h1 = jnp.maximum(
        jnp.dot(xt, w1[...], preferred_element_type=jnp.float32) + b1[...], 0.0)
    # conv2 / conv3 on the MXU with bf16 operands, f32 accumulation.
    h2 = jnp.maximum(
        jnp.dot(h1.astype(jnp.bfloat16), w2[...],
                preferred_element_type=jnp.float32) + b2[...], 0.0)
    h3 = jnp.maximum(
        jnp.dot(h2.astype(jnp.bfloat16), w3[...],
                preferred_element_type=jnp.float32) + b3[...], 0.0)

    if n_total % n_tile != 0:
        # Tail tile: zero the rows past the true point count before the max.
        # Safe because ReLU guarantees every valid h3 value (and hence the
        # true max) is >= 0.
        row = jax.lax.broadcasted_iota(jnp.int32, (n_tile, 1), 0)
        h3 = jnp.where(row + nt * n_tile < n_total, h3, 0.0)

    gmax[...] = jnp.maximum(gmax[...], jnp.max(h3, axis=0, keepdims=True))

    @pl.when(nt == pl.num_programs(1) - 1)
    def _():
        g_ref[...] = gmax[...]


def stn3d_head_kernel(g_ref, wf1, bf1, wf2, bf2, wf3, bf3, o_ref):
    """fc1/fc2/fc3 head, batched over all B pooled features at once.

    g_ref: (B, 1024); wf1/wf2 are bf16 (f32 accumulation), fc3 stays f32 and is
    zero-padded to 128 output lanes so the final store is lane-dense; the 9
    real columns are sliced in the wrapper.
    """
    g = g_ref[...].astype(jnp.bfloat16)
    f = jnp.maximum(
        jnp.dot(g, wf1[...], preferred_element_type=jnp.float32) + bf1[...], 0.0)
    f = jnp.maximum(
        jnp.dot(f.astype(jnp.bfloat16), wf2[...],
                preferred_element_type=jnp.float32) + bf2[...], 0.0)
    o_ref[...] = jnp.dot(f, wf3[...], preferred_element_type=jnp.float32) + bf3[...]


# ------------------------------- parameters ----------------------------------
def init_params(key, channel):
    ks = jax.random.split(key, 12)

    def lin(k, out_dim, in_dim):
        kw, kb = jax.random.split(k)
        w = jax.random.normal(kw, (out_dim, in_dim), jnp.float32) / np.sqrt(in_dim)
        b = 0.01 * jax.random.normal(kb, (out_dim,), jnp.float32)
        return w, b

    def bn(k, dim):
        kg, kb, km, kv = jax.random.split(k, 4)
        gamma = 1.0 + 0.1 * jax.random.normal(kg, (dim,), jnp.float32)
        beta = 0.1 * jax.random.normal(kb, (dim,), jnp.float32)
        mean = 0.1 * jax.random.normal(km, (dim,), jnp.float32)
        var = jnp.abs(1.0 + 0.1 * jax.random.normal(kv, (dim,), jnp.float32))
        return gamma, beta, mean, var

    return dict(
        conv1=lin(ks[0], 64, channel), bn1=bn(ks[1], 64),
        conv2=lin(ks[2], 128, 64),     bn2=bn(ks[3], 128),
        conv3=lin(ks[4], 1024, 128),   bn3=bn(ks[5], 1024),
        fc1=lin(ks[6], 512, 1024),     bn4=bn(ks[7], 512),
        fc2=lin(ks[8], 256, 512),      bn5=bn(ks[9], 256),
        fc3=lin(ks[10], 9, 256),
    )


def _fold_bn(lin, bn):
    # inference-mode BN folded into the preceding conv/fc.
    (w, b), (gamma, beta, mean, var) = lin, bn
    scale = gamma / jnp.sqrt(var + EPS)
    return w * scale[:, None], (b - mean) * scale + beta


def _conv_weights(params):
    w1, b1 = _fold_bn(params["conv1"], params["bn1"])   # (64,C), (64,)
    w2, b2 = _fold_bn(params["conv2"], params["bn2"])   # (128,64), (128,)
    w3, b3 = _fold_bn(params["conv3"], params["bn3"])   # (1024,128), (1024,)
    return [
        jnp.asarray(w1.T, jnp.float32),                  # (C, 64)   f32 (K=3)
        jnp.asarray(b1, jnp.float32).reshape(1, -1),     # (1, 64)
        jnp.asarray(w2.T, jnp.bfloat16),                 # (64, 128) bf16 MXU operand
        jnp.asarray(b2, jnp.float32).reshape(1, -1),     # (1, 128)
        jnp.asarray(w3.T, jnp.bfloat16),                 # (128, 1024) bf16
        jnp.asarray(b3, jnp.float32).reshape(1, -1),     # (1, 1024)
    ]


def _head_weights(params):
    wf1, bf1 = _fold_bn(params["fc1"], params["bn4"])    # (512,1024), (512,)
    wf2, bf2 = _fold_bn(params["fc2"], params["bn5"])    # (256,512), (256,)
    wf3, bf3 = params["fc3"]                             # (9,256), (9,)
    # Pad fc3 to 128 output lanes so the kernel's output store is lane-dense.
    wf3p = jnp.zeros((256, 128), jnp.float32).at[:, :9].set(
        jnp.asarray(wf3.T, jnp.float32))
    bf3p = jnp.zeros((1, 128), jnp.float32).at[0, :9].set(
        jnp.asarray(bf3, jnp.float32))
    return [
        jnp.asarray(wf1.T, jnp.bfloat16),                # (1024, 512) bf16
        jnp.asarray(bf1, jnp.float32).reshape(1, -1),    # (1, 512)
        jnp.asarray(wf2.T, jnp.bfloat16),                # (512, 256) bf16
        jnp.asarray(bf2, jnp.float32).reshape(1, -1),    # (1, 256)
        wf3p, bf3p,                                      # (256, 128), (1, 128) f32
    ]


def _pick_n_tile(n, cap):
    # If N fits in one tile, use the exact extent (block == full dim is always
    # legal).  Otherwise use a fixed lane-aligned tile and mask the tail in
    # the kernel -- VMEM stays bounded independent of N.
    cap = max(128, (cap // 128) * 128)
    return n if n <= cap else cap


# -------------------------------- wrapper -------------------------------------
def stn3d_forward(x_ncw, params, *, n_tile_cap=DEFAULT_N_TILE_CAP):
    B, C, N = x_ncw.shape
    x = x_ncw.astype(jnp.float32)          # native (B, C, N): no transpose pass

    n_tile = _pick_n_tile(N, n_tile_cap)
    num_tiles = pl.cdiv(N, n_tile)

    conv_weights = _conv_weights(params)
    in_specs = [pl.BlockSpec((None, C, n_tile), lambda b, nt: (b, 0, nt))]
    for w in conv_weights:                 # grid-invariant weight blocks
        # TODO(synk): pipeline_mode=pl.Buffered(1) would drop the redundant
        # second buffer of these never-refetched weights (~0.15 MiB bf16);
        # left at the default for a version-agnostic build.
        in_specs.append(pl.BlockSpec(w.shape, lambda b, nt: (0, 0)))

    pool_kernel = functools.partial(stn3d_pool_kernel,
                                    n_total=N, n_tile=n_tile)

    # Per-batch pooled feature g, written lane-dense as (B, 1, 1024).
    g = pl.pallas_call(
        pool_kernel,
        out_shape=jax.ShapeDtypeStruct((B, 1, 1024), jnp.float32),
        grid=(B, num_tiles),
        in_specs=in_specs,
        out_specs=pl.BlockSpec((None, 1, 1024), lambda b, nt: (b, 0, 0)),
        scratch_shapes=[pltpu.VMEM((1, 1024), jnp.float32)],
        compiler_params=pltpu.CompilerParams(
            dimension_semantics=("parallel", "arbitrary"),
            vmem_limit_bytes=VMEM_LIMIT),
    )(x, *conv_weights)
    g = g.reshape(B, 1024)

    # fc1/fc2/fc3 head once for all batch elements (M = B batched matmuls).
    head_weights = _head_weights(params)
    head_in_specs = [pl.BlockSpec((B, 1024), lambda i: (0, 0))]
    for w in head_weights:
        head_in_specs.append(pl.BlockSpec(w.shape, lambda i: (0, 0)))

    out = pl.pallas_call(
        stn3d_head_kernel,
        out_shape=jax.ShapeDtypeStruct((B, 128), jnp.float32),
        grid=(1,),
        in_specs=head_in_specs,
        out_specs=pl.BlockSpec((B, 128), lambda i: (0, 0)),
        compiler_params=pltpu.CompilerParams(
            dimension_semantics=("arbitrary",),
            vmem_limit_bytes=VMEM_LIMIT),
    )(g, *head_weights)

    iden = jnp.eye(3, dtype=jnp.float32).reshape(1, 9)
    out = out[:, :9] + iden                 # x = x + iden (drop the lane padding)
    return out.reshape(B, 3, 3)             # x.view(-1, 3, 3)


# ------------------------- pure-JAX reference checks ---------------------------
def reference_matched(x_ncw, params):
    """Same folded weights and bf16 operand casts as the kernels (tight check)."""
    w1t, b1, w2t, b2, w3t, b3 = _conv_weights(params)
    wf1t, bf1, wf2t, bf2, wf3p, bf3p = _head_weights(params)
    bf16 = jnp.bfloat16
    xt = jnp.transpose(x_ncw.astype(jnp.float32), (0, 2, 1))          # (B,N,C)
    h1 = jnp.maximum(jnp.einsum("bnc,co->bno", xt, w1t,
                                preferred_element_type=jnp.float32) + b1, 0.0)
    h2 = jnp.maximum(jnp.einsum("bnk,ko->bno", h1.astype(bf16), w2t,
                                preferred_element_type=jnp.float32) + b2, 0.0)
    h3 = jnp.maximum(jnp.einsum("bnk,ko->bno", h2.astype(bf16), w3t,
                                preferred_element_type=jnp.float32) + b3, 0.0)
    g = jnp.max(h3, axis=1)                                           # (B,1024)
    f = jnp.maximum(jnp.einsum("bk,ko->bo", g.astype(bf16), wf1t,
                               preferred_element_type=jnp.float32) + bf1, 0.0)
    f = jnp.maximum(jnp.einsum("bk,ko->bo", f.astype(bf16), wf2t,
                               preferred_element_type=jnp.float32) + bf2, 0.0)
    out = jnp.einsum("bk,ko->bo", f, wf3p,
                     preferred_element_type=jnp.float32) + bf3p
    out = out[:, :9] + jnp.eye(3, dtype=jnp.float32).reshape(1, 9)
    return out.reshape(-1, 3, 3)


def reference_f32(x_ncw, params):
    """PyTorch-faithful full-f32 reference (loose check for bf16 drift)."""
    def conv_bn_relu(x, lin, bn):
        (w, b), (gamma, beta, mean, var) = lin, bn
        y = jnp.einsum("oc,bcn->bon", w, x) + b[None, :, None]
        y = (y - mean[None, :, None]) * (gamma / jnp.sqrt(var + EPS))[None, :, None] \
            + beta[None, :, None]
        return jnp.maximum(y, 0.0)

    def fc_bn_relu(x, lin, bn):
        (w, b), (gamma, beta, mean, var) = lin, bn
        y = x @ w.T + b
        y = (y - mean) * (gamma / jnp.sqrt(var + EPS)) + beta
        return jnp.maximum(y, 0.0)

    x = conv_bn_relu(x_ncw, params["conv1"], params["bn1"])
    x = conv_bn_relu(x, params["conv2"], params["bn2"])
    x = conv_bn_relu(x, params["conv3"], params["bn3"])
    x = jnp.max(x, axis=2)
    x = fc_bn_relu(x, params["fc1"], params["bn4"])
    x = fc_bn_relu(x, params["fc2"], params["bn5"])
    w, b = params["fc3"]
    x = x @ w.T + b + jnp.eye(3, dtype=jnp.float32).reshape(1, 9)
    return x.reshape(-1, 3, 3)


if __name__ == "__main__":
    key = jax.random.PRNGKey(0)
    kx, kp = jax.random.split(key)
    B, C = 2, 3
    params = init_params(kp, C)

    # (N, n_tile_cap): single-tile, multi-tile running max, and masked-tail
    # (200 = 128 + 72) paths, all at small shapes.
    cases = [(16, DEFAULT_N_TILE_CAP), (256, 128), (200, 128)]
    for N, cap in cases:
        x = jax.random.normal(jax.random.fold_in(kx, N), (B, C, N), jnp.float32)
        out = jax.block_until_ready(stn3d_forward(x, params, n_tile_cap=cap))
        assert out.shape == (B, 3, 3)
        # Tight check vs a reference using the same bf16-operand numerics.
        np.testing.assert_allclose(np.asarray(out),
                                   np.asarray(reference_matched(x, params)),
                                   rtol=2e-3, atol=2e-3)
        # Loose check vs the PyTorch-faithful full-f32 path (bf16 drift bound).
        np.testing.assert_allclose(np.asarray(out),
                                   np.asarray(reference_f32(x, params)),
                                   rtol=3e-2, atol=8e-2)
    print("KERNEL_OK")
</pallas_src>

<mosaic_0001>
module attributes {stable_mosaic.version = 11 : i64} {
  func.func @stn3d_pool_kernel(%arg0: i32, %arg1: i32, %arg2: memref<1x3x16xf32, #tpu.memory_space<vmem>>, %arg3: memref<3x64xf32, #tpu.memory_space<vmem>>, %arg4: memref<1x64xf32, #tpu.memory_space<vmem>>, %arg5: memref<64x128xbf16, #tpu.memory_space<vmem>>, %arg6: memref<1x128xf32, #tpu.memory_space<vmem>>, %arg7: memref<128x1024xbf16, #tpu.memory_space<vmem>>, %arg8: memref<1x1024xf32, #tpu.memory_space<vmem>>, %arg9: memref<1x1x1024xf32, #tpu.memory_space<vmem>>, %arg10: memref<1x1024xf32, #tpu.memory_space<vmem>>) attributes {dimension_semantics = [#tpu.dimension_semantics<parallel>, #tpu.dimension_semantics<arbitrary>], iteration_bounds = array<i64: 2, 1>, scalar_prefetch = 0 : i64, scratch_operands = 1 : i64, tpu.core_type = #tpu.core_type<tc>, window_params = [{transform_indices = @transform_0, window_bounds = array<i64: 1, 3, 16>}, {pipeline_mode = #tpu.pipeline_mode<synchronous>, transform_indices = @transform_1, window_bounds = array<i64: 3, 64>}, {pipeline_mode = #tpu.pipeline_mode<synchronous>, transform_indices = @transform_2, window_bounds = array<i64: 1, 64>}, {pipeline_mode = #tpu.pipeline_mode<synchronous>, transform_indices = @transform_3, window_bounds = array<i64: 64, 128>}, {pipeline_mode = #tpu.pipeline_mode<synchronous>, transform_indices = @transform_4, window_bounds = array<i64: 1, 128>}, {pipeline_mode = #tpu.pipeline_mode<synchronous>, transform_indices = @transform_5, window_bounds = array<i64: 128, 1024>}, {pipeline_mode = #tpu.pipeline_mode<synchronous>, transform_indices = @transform_6, window_bounds = array<i64: 1, 1024>}, {transform_indices = @transform_7, window_bounds = array<i64: 1, 1, 1024>}]} {
    %c0_i32 = arith.constant 0 : i32
    %0 = arith.cmpi eq, %arg1, %c0_i32 : i32
    %1 = arith.extui %0 : i1 to i32
    %c0_i32_0 = arith.constant 0 : i32
    %2 = arith.cmpi ne, %1, %c0_i32_0 : i32
    scf.if %2 {
      %cst_27 = arith.constant 0.000000e+00 : f32
      %37 = vector.broadcast %cst_27 : f32 to vector<1x1024xf32>
      %c0_28 = arith.constant 0 : index
      %c0_29 = arith.constant 0 : index
      %38 = vector.load %arg10[%c0_28, %c0_29] : memref<1x1024xf32, #tpu.memory_space<vmem>>, vector<1x1024xf32>
      tpu.vector_store %arg10[%c0_28, %c0_29], %37 {strides = array<i32>} : memref<1x1024xf32, #tpu.memory_space<vmem>>, vector<1x1024xf32>,
    } else {
    }
    %c0 = arith.constant 0 : index
    %c0_1 = arith.constant 0 : index
    %c0_2 = arith.constant 0 : index
    %3 = vector.load %arg2[%c0, %c0_1, %c0_2] : memref<1x3x16xf32, #tpu.memory_space<vmem>>, vector<1x3x16xf32>
    %4 = vector.shape_cast %3 : vector<1x3x16xf32> to vector<3x16xf32>
    %5 = tpu.transpose %4, [1, 0] : vector<3x16xf32> -> vector<16x3xf32>
    %c0_3 = arith.constant 0 : index
    %c0_4 = arith.constant 0 : index
    %6 = vector.load %arg3[%c0_3, %c0_4] : memref<3x64xf32, #tpu.memory_space<vmem>>, vector<3x64xf32>
    %cst = arith.constant dense<0.000000e+00> : vector<16x64xf32>
    %7 = tpu.matmul %5, %6, %cst {dimension_numbers = #tpu.dot_dimension_numbers<[1], [0], [0], [1], [0, 0, 1, 1], [], []>} : vector<16x3xf32>, vector<3x64xf32>, vector<16x64xf32> -> vector<16x64xf32>
    %c0_5 = arith.constant 0 : index
    %c0_6 = arith.constant 0 : index
    %8 = vector.load %arg4[%c0_5, %c0_6] : memref<1x64xf32, #tpu.memory_space<vmem>>, vector<1x64xf32>
    %9 = vector.broadcast %8 : vector<1x64xf32> to vector<16x64xf32>
    %10 = arith.addf %7, %9 : vector<16x64xf32>
    %cst_7 = arith.constant 0.000000e+00 : f32
    %11 = vector.broadcast %cst_7 : f32 to vector<16x64xf32>
    %12 = arith.maximumf %10, %11 : vector<16x64xf32>
    %13 = arith.truncf %12 : vector<16x64xf32> to vector<16x64xbf16>
    %c0_8 = arith.constant 0 : index
    %c0_9 = arith.constant 0 : index
    %14 = vector.load %arg5[%c0_8, %c0_9] : memref<64x128xbf16, #tpu.memory_space<vmem>>, vector<64x128xbf16>
    %cst_10 = arith.constant dense<0.000000e+00> : vector<16x128xf32>
    %15 = tpu.matmul %13, %14, %cst_10 {dimension_numbers = #tpu.dot_dimension_numbers<[1], [0], [0], [1], [0, 0, 1, 1], [], []>} : vector<16x64xbf16>, vector<64x128xbf16>, vector<16x128xf32> -> vector<16x128xf32>
    %c0_11 = arith.constant 0 : index
    %c0_12 = arith.constant 0 : index
    %16 = vector.load %arg6[%c0_11, %c0_12] : memref<1x128xf32, #tpu.memory_space<vmem>>, vector<1x128xf32>
    %17 = vector.broadcast %16 : vector<1x128xf32> to vector<16x128xf32>
    %18 = arith.addf %15, %17 : vector<16x128xf32>
    %cst_13 = arith.constant 0.000000e+00 : f32
    %19 = vector.broadcast %cst_13 : f32 to vector<16x128xf32>
    %20 = arith.maximumf %18, %19 : vector<16x128xf32>
    %21 = arith.truncf %20 : vector<16x128xf32> to vector<16x128xbf16>
    %c0_14 = arith.constant 0 : index
    %c0_15 = arith.constant 0 : index
    %22 = vector.load %arg7[%c0_14, %c0_15] : memref<128x1024xbf16, #tpu.memory_space<vmem>>, vector<128x1024xbf16>
    %cst_16 = arith.constant dense<0.000000e+00> : vector<16x1024xf32>
    %23 = tpu.matmul %21, %22, %cst_16 {dimension_numbers = #tpu.dot_dimension_numbers<[1], [0], [0], [1], [0, 0, 1, 1], [], []>} : vector<16x128xbf16>, vector<128x1024xbf16>, vector<16x1024xf32> -> vector<16x1024xf32>
    %c0_17 = arith.constant 0 : index
    %c0_18 = arith.constant 0 : index
    %24 = vector.load %arg8[%c0_17, %c0_18] : memref<1x1024xf32, #tpu.memory_space<vmem>>, vector<1x1024xf32>
    %25 = vector.broadcast %24 : vector<1x1024xf32> to vector<16x1024xf32>
    %26 = arith.addf %23, %25 : vector<16x1024xf32>
    %cst_19 = arith.constant 0.000000e+00 : f32
    %27 = vector.broadcast %cst_19 : f32 to vector<16x1024xf32>
    %28 = arith.maximumf %26, %27 : vector<16x1024xf32>
    %c0_20 = arith.constant 0 : index
    %c0_21 = arith.constant 0 : index
    %29 = vector.load %arg10[%c0_20, %c0_21] : memref<1x1024xf32, #tpu.memory_space<vmem>>, vector<1x1024xf32>
    %cst_22 = arith.constant dense<0xFF800000> : vector<1024xf32>
    %30 = vector.multi_reduction <maximumf>, %28, %cst_22 [0] : vector<16x1024xf32> to vector<1024xf32>
    %31 = vector.shape_cast %30 : vector<1024xf32> to vector<1x1024xf32>
    %32 = arith.maximumf %29, %31 : vector<1x1024xf32>
    %c0_23 = arith.constant 0 : index
    %c0_24 = arith.constant 0 : index
    %33 = vector.load %arg10[%c0_23, %c0_24] : memref<1x1024xf32, #tpu.memory_space<vmem>>, vector<1x1024xf32>
    tpu.vector_store %arg10[%c0_23, %c0_24], %32 {strides = array<i32>} : memref<1x1024xf32, #tpu.memory_space<vmem>>, vector<1x1024xf32>,
    %c0_i32_25 = arith.constant 0 : i32
    %34 = arith.cmpi eq, %arg1, %c0_i32_25 : i32
    %35 = arith.extui %34 : i1 to i32
    %c0_i32_26 = arith.constant 0 : i32
    %36 = arith.cmpi ne, %35, %c0_i32_26 : i32
    scf.if %36 {
      %c0_27 = arith.constant 0 : index
      %c0_28 = arith.constant 0 : index
      %37 = vector.load %arg10[%c0_27, %c0_28] : memref<1x1024xf32, #tpu.memory_space<vmem>>, vector<1x1024xf32>
      %c0_29 = arith.constant 0 : index
      %c0_30 = arith.constant 0 : index
      %c0_31 = arith.constant 0 : index
      %38 = vector.load %arg9[%c0_29, %c0_30, %c0_31] : memref<1x1x1024xf32, #tpu.memory_space<vmem>>, vector<1x1x1024xf32>
      %39 = vector.shape_cast %38 : vector<1x1x1024xf32> to vector<1x1024xf32>
      %40 = vector.shape_cast %37 : vector<1x1024xf32> to vector<1x1x1024xf32>
      tpu.vector_store %arg9[%c0_29, %c0_30, %c0_31], %40 {strides = array<i32>} : memref<1x1x1024xf32, #tpu.memory_space<vmem>>, vector<1x1x1024xf32>,
    } else {
    }
    return
  }
  func.func @transform_0(%arg0: i32, %arg1: i32) -> (i32, i32, i32) {
    %c0_i32 = arith.constant 0 : i32
    %c0_i32_0 = arith.constant 0 : i32
    return %arg0, %c0_i32, %arg1 : i32, i32, i32
  }
  func.func @transform_1(%arg0: i32, %arg1: i32) -> (i32, i32) {
    %c0_i32 = arith.constant 0 : i32
    %c0_i32_0 = arith.constant 0 : i32
    %c0_i32_1 = arith.constant 0 : i32
    return %c0_i32, %c0_i32_0 : i32, i32
  }
  func.func @transform_2(%arg0: i32, %arg1: i32) -> (i32, i32) {
    %c0_i32 = arith.constant 0 : i32
    %c0_i32_0 = arith.constant 0 : i32
    %c0_i32_1 = arith.constant 0 : i32
    return %c0_i32, %c0_i32_0 : i32, i32
  }
  func.func @transform_3(%arg0: i32, %arg1: i32) -> (i32, i32) {
    %c0_i32 = arith.constant 0 : i32
    %c0_i32_0 = arith.constant 0 : i32
    %c0_i32_1 = arith.constant 0 : i32
    return %c0_i32, %c0_i32_0 : i32, i32
  }
  func.func @transform_4(%arg0: i32, %arg1: i32) -> (i32, i32) {
    %c0_i32 = arith.constant 0 : i32
    %c0_i32_0 = arith.constant 0 : i32
    %c0_i32_1 = arith.constant 0 : i32
    return %c0_i32, %c0_i32_0 : i32, i32
  }
  func.func @transform_5(%arg0: i32, %arg1: i32) -> (i32, i32) {
    %c0_i32 = arith.constant 0 : i32
    %c0_i32_0 = arith.constant 0 : i32
    %c0_i32_1 = arith.constant 0 : i32
    return %c0_i32, %c0_i32_0 : i32, i32
  }
  func.func @transform_6(%arg0: i32, %arg1: i32) -> (i32, i32) {
    %c0_i32 = arith.constant 0 : i32
    %c0_i32_0 = arith.constant 0 : i32
    %c0_i32_1 = arith.constant 0 : i32
    return %c0_i32, %c0_i32_0 : i32, i32
  }
  func.func @transform_7(%arg0: i32, %arg1: i32) -> (i32, i32, i32) {
    %c0_i32 = arith.constant 0 : i32
    %c0_i32_0 = arith.constant 0 : i32
    %c0_i32_1 = arith.constant 0 : i32
    return %arg0, %c0_i32, %c0_i32_0 : i32, i32, i32
  }
}

</mosaic_0001>

<bundles_post_ra>
// kernel: tpu_custom_call.1
= control target key start
LH: loop header
LB: loop body
LE: loop exit
PB: predicated region body
PF: predicated region fallthrough
CT: control target
= control target key end

     0   :  { %12 = vsyncpa [#allocation4], 0  ;;  %s2035_s0 = inlined_call_operand.vmem [shape: f32[2,3,16], index: 0, kind: input, shape index: {}]   ;;  %s2036_s1 = inlined_call_operand.vmem [shape: f32[3,64], index: 1, kind: input, shape index: {}]   ;;  %s2037_s2 = inlined_call_operand.vmem [shape: f32[1,64], index: 2, kind: input, shape index: {}]   ;;  %s2038_s3 = inlined_call_operand.hbm [shape: bf16[64,128], index: 3, kind: input, shape index: {}]   ;;  %s2039_s4 = inlined_call_operand.vmem [shape: f32[1,128], index: 4, kind: input, shape index: {}]   ;;  %s2040_s5 = inlined_call_operand.hbm [shape: bf16[128,1024], index: 5, kind: input, shape index: {}]   ;;  %s2041_s6 = inlined_call_operand.vmem [shape: f32[1,1024], index: 6, kind: input, shape index: {}]   ;;  %s2042_s7 = inlined_call_operand.hbm [shape: f32[2,1,1024], index: 7, kind: output, shape index: {}]  }
   0x1   :  { %13 = vsyncpa [#allocation7], 0 }
   0x2   :  { %14 = vsyncpa [#allocation5], 0 }
   0x3   :  { %16 = vsyncpa [#allocation5 + $0x1], 0  ;;  %s1792_s24 = smov 0   ;;  %s1794_s25 = smov 0  }
   0x4   :  { %s1796_s26 = smov 0   ;;  %s1798_s27 = smov 0  }
   0x5   :  { %s1800_s28 = smov 0   ;;  %s1802_s29 = smov 0  }
   0x6 LB: > { %2049 = sst [smem:[#allocation12_spill]] %s1735_s28  ;;  %s1393_s30 = sadd.s32 4294967295, %s1739_s29   ;;  %s1739_s29 = sphi %s1802_s29, %s22_s29   ;;  %s1735_s28 = sphi %s1800_s28, %s2063_s28   ;;  %s1731_s27 = sphi %s1798_s27, %s2062_s27   ;;  %s1727_s26 = sphi %s1796_s26, %s2066_s26   ;;  %s1723_s25 = sphi %s1794_s25, %s2065_s25   ;;  %s1719_s24 = sphi %s1792_s24, %s2064_s24  }
   0x7   : > { %s1394_s8 = sadd.s32 4294967294, %s1739_s29   ;;  %s34_s9 = sadd.s32 1, %s1735_s28 }
   0x8   : > { %s195_s10 = sadd.s32 1, %s1727_s26  ;;  %p36_p0 = scmp.ge.s32.totalorder %s34_s9, 2 }
   0x9   : > { %p205_p1 = scmp.ne.s32.totalorder %s1727_s26, %s1723_s25  ;;  %p206_p2 = scmp.eq.s32.totalorder %s1393_s30, 1 }
   0xa   : > { %p211_p3 = scmp.ne.s32.totalorder %s1723_s25, %s1719_s24  ;;  %s2068_s9 = smov (%p36_p0, %s34_s9), 0 }
   0xb   : > { %2050 = sst [smem:[#allocation13_spill]] %s2068_s9  ;;  %p1832_p4 = por %p206_p2, %p205_p1 }
   0xc   : > { %p212_p5 = scmp.eq.s32.totalorder %s1394_s8, 1  ;;  %s192_s12 = ssub.s32 %s1735_s28, %s2068_s9 }
   0xd   : > { %s2051_s11 = scalar_select %p1832_p4, 1, 0 }
   0xe   : > { %p1395_p6 = scmp.ge.s32.totalorder %s1739_s29, 1  ;;  %p193_p7 = scmp.eq.s32.totalorder %s192_s12, 0 }
   0xf   : > { %p1839_p8 = por %p212_p5, %p211_p3  ;;  %p219_p9 = scmp.lt.s32.totalorder %s1739_s29, 3 }
  0x10   : > { %s1845_s14 = scalar_select %p193_p7, %s1727_s26, %s195_s10  }
  0x11   : > { %s2052_s13 = scalar_select %p1839_p8, 1, 0 }
  0x12   : > { %2053 = sst [smem:[#allocation14_spill]] %s1845_s14  ;;  %p1847_p10 = pnand %p1395_p6, %p219_p9 }
  0x13   : > { %p1851_p11 = scmp.eq.s32.totalorder %s1393_s30, 0  ;;  %s1741_s17 = smov [#allocation3]  }
  0x14   : > { %s2054_s15 = scalar_select %p1847_p10, 1, 0 }
  0x15   : > { %s2055_s16 = scalar_select %p1851_p11, 1, 0 }
  0x16   : > { %p1519_p12 = pneg %p1847_p10  ;;  %s237_s18 = sshll.u32 %s1741_s17, 4  ;;  %s238_s18 = int_to_ptr.vmem [resolvable:$true] %s237_s18 }
  0x17   : > { %s1742_s20 = smov [#allocation6]   ;;  %s1597_s30 = scalar_lea.hbm %s2038_s3, 512 }
  0x18   : > { %p1859_p13 = pnand %p1851_p11, %p1519_p12  ;;  %s253_s21 = sshll.u32 %s1742_s20, 4  ;;  %s1863_s21 = int_to_ptr.vmem [resolvable:$true] %s253_s21 }
  0x19   : > { %p1598_p0 = scmp.ne.s32.totalorder %s2038_s3, %s1597_s30  ;;  %p1604_p5 = scmp.lt.u32.totalorder %s1597_s30, %s2038_s3 }
  0x1a   : > { %p1599_p1 = pneg %p1859_p13 }
  0x1c   : > { %p1600_p2 = pnand %p1599_p1, %p1598_p0 }
  0x1e   : > { %p1601_p3 = pneg %p1600_p2 }
  0x20   : > { %p1606_p6 = pnand %p1604_p5, %p1601_p3 }
  0x22   : > { %1609 = shalt.err (!%p1606_p6)
}
  0x23   : > { %s1610_s20 = scalar_lea.vmem %s238_s18, 512  ;;  %p1618_p8 = scmp.lt.s32.totalorder %s238_s18, %s238_s18 }
  0x24   : > { %p1611_p7 = scmp.ne.s32.totalorder %s238_s18, %s1610_s20  ;;  %p1619_p4 = scmp.lt.s32.totalorder %s1610_s20, %s1610_s20 }
  0x26   : > { %p1613_p9 = pnand %p1611_p7, %p1599_p1  ;;  %p1620_p11 = por %p1619_p4, %p1618_p8 }
  0x28   : > { %p1614_p12 = pneg %p1613_p9 }
  0x2a   : > { %p1621_p10 = pnand %p1620_p11, %p1614_p12 }
  0x2c   : > { %1624 = shalt.err (!%p1621_p10)
}
  0x2d   : > { %s1743_s22 = smov 64   ;;  %s1744_s23 = smov 4  }
  0x2e   : > { %1522 = dma.hbm_to_vmem [thread:$0]  (!%p1859_p13), %s2038_s3, 512, %s238_s18, [#allocation4], %s1743_s22, %s1743_s22, %s1744_s23  }
  0x2f   : > { %s1625_s17 = scalar_lea.hbm %s2040_s5, 8192 }
  0x30   : > { %p1626_p0 = scmp.ne.s32.totalorder %s2040_s5, %s1625_s17  ;;  %p1632_p10 = scmp.lt.u32.totalorder %s1625_s17, %s2040_s5 }
  0x32   : > { %p1628_p4 = pnand %p1626_p0, %p1599_p1 }
  0x34   : > { %p1629_p8 = pneg %p1628_p4 }
  0x36   : > { %p1634_p11 = pnand %p1632_p10, %p1629_p8 }
  0x38   : > { %1637 = shalt.err (!%p1634_p11)
}
  0x39   : > { %s1638_s18 = scalar_lea.vmem %s1863_s21, 8192  ;;  %p1646_p6 = scmp.lt.s32.totalorder %s1863_s21, %s1863_s21 }
  0x3a   : > { %p1639_p2 = scmp.ne.s32.totalorder %s1863_s21, %s1638_s18  ;;  %p1647_p7 = scmp.lt.s32.totalorder %s1638_s18, %s1638_s18 }
  0x3c   : > { %p1641_p3 = pnand %p1639_p2, %p1599_p1  ;;  %p1648_p9 = por %p1647_p7, %p1646_p6 }
  0x3e   : > { %p1642_p5 = pneg %p1641_p3 }
  0x40   : > { %p1649_p12 = pnand %p1648_p9, %p1642_p5 }
  0x42   : > { %1652 = shalt.err (!%p1649_p12)
}
  0x43   : > { %s1745_s28 = smov 512   ;;  %s1746_s9 = smov 32  }
  0x44   : > { %1525 = dma.hbm_to_vmem [thread:$0]  (!%p1859_p13), %s2040_s5, 8192, %s1863_s21, [#allocation7], %s1745_s28, %s1745_s28, %s1746_s9  }
  0x45   : > { %p2057_p0 = scmp.ne.s32.totalorder %s2054_s15, 0 }
  0x46   : > { %p2058_p1 = scmp.ne.s32.totalorder (!%p2057_p0), %s2055_s16, 0 }
  0x47   : > { %282 = sbr.rel (%p2057_p0) target bundleno = 951 (0x3b7), region = 48 }
  0x4e   : > { %1706 = dma.done.wait (%p2058_p1), [#allocation4], 512  }
  0x4f   : > { %1708 = vsyncadd (%p2058_p1), [#allocation4], 4294966784 }
  0x50   : > { %1710 = dma.done.wait (%p2058_p1), [#allocation7], 8192  }
  0x51   : > { %1712 = vsyncadd (%p2058_p1), [#allocation7], 4294959104  ;;  %p320_p4 = scmp.lt.s32.totalorder %s1731_s27, 1  ;;  %v366_v1 = vld [vmem:[%s2036_s1] sm:$0x7]  ;;  %vm381_vm0 = vcmask 1042432  }
  0x52   : > { %1492 = vmatprep.subr.msk.mxu0 %vm381_vm0, %v366_v1  ;;  %v1593_v2 = vld [vmem:[#allocation3] sm:$0xff]   ;;  %v1747_v3 = vmov 0.0   ;;  %v1594_v4 = vld [vmem:[#allocation3 + $0x8] sm:$0xff]   ;;  %vm374_vm1 = vcmask 23552   ;;  %v1595_v7 = vld [vmem:[#allocation3 + $0x10] sm:$0xff]   ;;  %vm1748_vm2 = vmmov 0  }
  0x53   : > { %s321_s19 = scalar_select %p320_p4, %s1731_s27, 1  ;;  %1493 = vmatpush3.msk.msra.mxu0 %vm381_vm0, %v366_v1  ;;  %1497 = vmatprep.subr.bf16.mxu1 %v1747_v3  ;;  %v1596_v8 = vld [vmem:[#allocation3 + $0x18] sm:$0xff]   ;;  %v550_v9 = vld [vmem:[#allocation6] sm:$0xff]  ;;  %v551_v11 = vld [vmem:[#allocation6 + $0x8] sm:$0xff]  ;;  %vm502_vm3 = vcmask 523264  }
  0x54   : > { %1498 = vmatpush3.bf16.msra.mxu1 %v1593_v2  ;;  %1505 = vmatprep.mubr.msk.bf16.mxu1 %vm1748_vm2, %v1747_v3  ;;  %v554_v10 = vld [vmem:[#allocation6 + $0x20] sm:$0xff]  ;;  %v555_v14 = vld [vmem:[#allocation6 + $0x28] sm:$0xff]  ;;  %v1404_v37 = vld [vmem:[%s2037_s2] ss:$0 sm:$0xff]  ;;  %s317_s9 = sand.u32 1, %s1723_s25   ;;  %s1483_s22 = sshll.u32 %s1731_s27, 7 }
  0x55   : > { %s1403_s21 = sshll.u32 %s321_s19, 2  ;;  %1499 = vmatprep.subr.bf16.mxu1 %v1747_v3  ;;  %v1414_v12 = vcombine.low %v550_v9, %v554_v10  ;;  %v1415_v13 = vcombine.high %v550_v9, %v554_v10  ;;  %v558_v15 = vld [vmem:[#allocation6 + $0x40] sm:$0xff]  ;;  %v1416_v17 = vcombine.low %v551_v11, %v555_v14  ;;  %v1417_v18 = vcombine.high %v551_v11, %v555_v14  ;;  %v559_v43 = vld [vmem:[#allocation6 + $0x48] sm:$0xff]  ;;  %s1402_s14 = sshll.u32 %s317_s9, 3 }
  0x56   : > { %s326_s30 = scalar_lea.vmem %s2035_s0, %s1403_s21  ;;  %v562_v16 = vld [vmem:[#allocation6 + $0x60] sm:$0xff]  ;;  %v563_v44 = vld [vmem:[#allocation6 + $0x68] sm:$0xff]  ;;  %s319_s19 = scalar_lea.vmem [#allocation8], %s1402_s14 }
  0x57   : > { %v333_v0 = vld [vmem:[%s326_s30] sm:$0x7]  ;;  %v1423_v19 = vcombine.high %v558_v15, %v562_v16  ;;  %976 = vmatprep.subr.bf16.mxu0 %v1415_v13  ;;  %v1422_v20 = vcombine.low %v558_v15, %v562_v16  ;;  %v566_v21 = vld [vmem:[#allocation6 + $0x80] sm:$0xff]  ;;  %v1425_v47 = vcombine.high %v559_v43, %v563_v44  ;;  %v567_v48 = vld [vmem:[#allocation6 + $0x88] sm:$0xff]  ;;  %v1424_v50 = vcombine.low %v559_v43, %v563_v44  ;;  %s1301_s21 = sshll.u32 %s319_s19, 4  ;;  %s1988_s30 = scalar_lea.hbm %s2042_s7, %s1483_s22  ;;  %s1990_s21 = int_to_ptr.vmem [resolvable:$true] %s1301_s21 }
  0x58   : > { %334 = vxpose.xlu0.b32.start.end [1/1] (short) (narrow) %v333_v0, 16  ;;  %1500 = vmatpush3.bf16.msra.mxu1 %v1594_v4  ;;  %v570_v22 = vld [vmem:[#allocation6 + $0xa0] sm:$0xff]  ;;  %v571_v49 = vld [vmem:[#allocation6 + $0xa8] sm:$0xff]  ;;  %v572_v43 = vld [vmem:[#allocation6 + $0xb0] sm:$0xff]  ;;  %s1287_s8 = scalar_lea.sflag [#allocation5], %s317_s9  ;;  %s1653_s10 = scalar_lea.vmem %s1990_s21, 128 }
  0x59   : > { %1501 = vmatprep.subr.bf16.mxu1 %v1747_v3  ;;  %v1431_v23 = vcombine.high %v566_v21, %v570_v22  ;;  %v1430_v24 = vcombine.low %v566_v21, %v570_v22  ;;  %v574_v25 = vld [vmem:[#allocation6 + $0xc0] sm:$0xff]  ;;  %v1433_v51 = vcombine.high %v567_v48, %v571_v49  ;;  %v575_v52 = vld [vmem:[#allocation6 + $0xc8] sm:$0xff]  ;;  %v1432_v54 = vcombine.low %v567_v48, %v571_v49  ;;  %v557_v21 = vld [vmem:[#allocation6 + $0x38] sm:$0xff]  ;;  %p1654_p13 = scmp.ne.s32.totalorder %s1990_s21, %s1653_s10  ;;  %p2059_p8 = scmp.ne.s32.totalorder %s2051_s11, 0 }
  0x5a   : > { %v578_v26 = vld [vmem:[#allocation6 + $0xe0] sm:$0xff]  ;;  %v579_v53 = vld [vmem:[#allocation6 + $0xe8] sm:$0xff]  ;;  %v569_v44 = vld [vmem:[#allocation6 + $0x98] sm:$0xff]  ;;  %s1751_s27 = smov [#allocation8]  }
  0x5b   : > { %v1439_v27 = vcombine.high %v574_v25, %v578_v26  ;;  %v1438_v28 = vcombine.low %v574_v25, %v578_v26  ;;  %v582_v29 = vld [vmem:[#allocation6 + $0x100] sm:$0xff]  ;;  %v1441_v55 = vcombine.high %v575_v52, %v579_v53  ;;  %v583_v56 = vld [vmem:[#allocation6 + $0x108] sm:$0xff]  ;;  %v1440_v58 = vcombine.low %v575_v52, %v579_v53  ;;  %v1408_v26 = vld [vmem:[%s2039_s4] ss:$0 sm:$0xff]  ;;  %p1655_p10 = pnand %p1654_p13, %p2059_p8  ;;  %s1657_s16 = sshll.u32 %s1751_s27, 4  ;;  %s1658_s16 = int_to_ptr.vmem [resolvable:$false] %s1657_s16 }
  0x5c   : > { %1502 = vmatpush3.bf16.msra.mxu1 %v1595_v7  ;;  %v586_v30 = vld [vmem:[#allocation6 + $0x120] sm:$0xff]  ;;  %v587_v57 = vld [vmem:[#allocation6 + $0x128] sm:$0xff]  ;;  %v1749_v25 = vmov 0   ;;  %v577_v52 = vld [vmem:[#allocation6 + $0xd8] sm:$0xff]  ;;  %s1659_s12 = scalar_lea.vmem %s1658_s16, 256  ;;  %p1660_p2 = scmp.lt.s32.totalorder %s1990_s21, %s1658_s16 }
  0x5d   : > { %1503 = vmatprep.subr.bf16.mxu1 %v1747_v3  ;;  %v1447_v31 = vcombine.high %v582_v29, %v586_v30  ;;  %v1446_v32 = vcombine.low %v582_v29, %v586_v30  ;;  %v590_v33 = vld [vmem:[#allocation6 + $0x140] sm:$0xff]  ;;  %v1449_v59 = vcombine.high %v583_v56, %v587_v57  ;;  %v591_v60 = vld [vmem:[#allocation6 + $0x148] sm:$0xff]  ;;  %v1448_v62 = vcombine.low %v583_v56, %v587_v57  ;;  %v581_v53 = vld [vmem:[#allocation6 + $0xf8] sm:$0xff]  ;;  %p1656_p11 = pneg %p1655_p10  ;;  %p1661_p3 = scmp.lt.s32.totalorder %s1659_s12, %s1653_s10 }
  0x5e   : > { %v594_v34 = vld [vmem:[#allocation6 + $0x160] sm:$0xff]  ;;  %v595_v61 = vld [vmem:[#allocation6 + $0x168] sm:$0xff]  ;;  %v1445_v57 = vcombine.high %v577_v52, %v581_v53 }
  0x5f   : > { %v1455_v35 = vcombine.high %v590_v33, %v594_v34  ;;  %v1454_v36 = vcombine.low %v590_v33, %v594_v34  ;;  %v1457_v63 = vcombine.high %v591_v60, %v595_v61  ;;  %v1456_v0 = vcombine.low %v591_v60, %v595_v61  ;;  %v598_v1 = vld [vmem:[#allocation6 + $0x180] sm:$0xff]  ;;  %v599_v3 = vld [vmem:[#allocation6 + $0x188] sm:$0xff]  ;;  %v560_v33 = vld [vmem:[#allocation6 + $0x50] sm:$0xff]  ;;  %p1662_p5 = por %p1661_p3, %p1660_p2 }
  0x60   : > { %1504 = vmatpush3.bf16.msra.mxu1 %v1596_v8  ;;  %v602_v2 = vld [vmem:[#allocation6 + $0x1a0] sm:$0xff]  ;;  %v607_v11 = vld [vmem:[#allocation6 + $0x1c8] sm:$0xff]  ;;  %v564_v34 = vld [vmem:[#allocation6 + $0x70] sm:$0xff] }
  0x61   : > { %1019 = vmatprep.subr.bf16.mxu1 %v1417_v18  ;;  %v1463_v4 = vcombine.high %v598_v1, %v602_v2  ;;  %v606_v9 = vld [vmem:[#allocation6 + $0x1c0] sm:$0xff]  ;;  %v611_v13 = vld [vmem:[#allocation6 + $0x1e8] sm:$0xff]  ;;  %v556_v18 = vld [vmem:[#allocation6 + $0x30] sm:$0xff]  ;;  %p1663_p6 = pnand %p1662_p5, %p1656_p11 }
  0x62   : > { %v610_v10 = vld [vmem:[#allocation6 + $0x1e0] sm:$0xff]  ;;  %v1472_v15 = vcombine.low %v607_v11, %v611_v13  ;;  %v1473_v16 = vcombine.high %v607_v11, %v611_v13  ;;  %v585_v60 = vld [vmem:[#allocation6 + $0x118] sm:$0xff]  ;;  %v604_v11 = vld [vmem:[#allocation6 + $0x1b0] sm:$0xff] }
  0x63   : > { %v1470_v14 = vcombine.low %v606_v9, %v610_v10  ;;  %v589_v61 = vld [vmem:[#allocation6 + $0x138] sm:$0xff] }
  0x64   : > { %v605_v13 = vld [vmem:[#allocation6 + $0x1b8] sm:$0xff] }
  0xd8   : > { %v350_v5 = vpop.trf.xlu0 }
  0xd9   : > { %1494 = vmatprep.mubr.msk.f32.mxu0 %vm374_vm1, %v350_v5  ;;  %v603_v5 = vld [vmem:[#allocation6 + $0x1a8] sm:$0xff] }
  0xda   : > { %v1464_v7 = vcombine.low %v599_v3, %v603_v5  ;;  %v1465_v8 = vcombine.high %v599_v3, %v603_v5  ;;  %v596_v3 = vld [vmem:[#allocation6 + $0x170] sm:$0xff]  ;;  %v597_v5 = vld [vmem:[#allocation6 + $0x178] sm:$0xff] }
  0xdc   : > { %v351_v6 = vpop.trf.xlu0 }
  0xdd   : > { %1495 = vmatmul.mubr.msk.f32.vlgmr.msra.gmra.mrb[0].mxu0 %vm374_vm1, %v351_v6  ;;  %v1462_v6 = vcombine.low %v598_v1, %v602_v2  ;;  %v1453_v1 = vcombine.high %v585_v60, %v589_v61  ;;  %v592_v2 = vld [vmem:[#allocation6 + $0x150] sm:$0xff] }
  0xde   : > { %977 = vmatpush1.bf16.msra.mxu0 %v1414_v12  ;;  %v1471_v12 = vcombine.high %v606_v9, %v610_v10  ;;  %1008 = vmatprep.mubr.bf16.mxu0 %v1749_v25  ;;  %v600_v10 = vld [vmem:[#allocation6 + $0x190] sm:$0xff] }
  0xdf   : > { %978 = vmatprep.subr.bf16.mxu0 %v1423_v19  ;;  %v553_v19 = vld [vmem:[#allocation6 + $0x18] sm:$0xff] }
  0xe2   : > { %979 = vmatpush1.bf16.msra.mxu0 %v1422_v20 }
  0xe3   : > { %980 = vmatprep.subr.bf16.mxu0 %v1431_v23  ;;  %v1420_v23 = vcombine.low %v553_v19, %v557_v21 }
  0xe6   : > { %981 = vmatpush1.bf16.msra.mxu0 %v1430_v24  ;;  %v1421_v24 = vcombine.high %v553_v19, %v557_v21  ;;  %v612_v19 = vld [vmem:[#allocation6 + $0x1f0] sm:$0xff]  ;;  %v613_v21 = vld [vmem:[#allocation6 + $0x1f8] sm:$0xff] }
  0xe7   : > { %982 = vmatprep.subr.bf16.mxu0 %v1439_v27 }
  0xea   : > { %983 = vmatpush1.bf16.msra.mxu0 %v1438_v28 }
  0xeb   : > { %984 = vmatprep.subr.bf16.mxu0 %v1447_v31 }
  0xee   : > { %985 = vmatpush1.bf16.msra.mxu0 %v1446_v32 }
  0xef   : > { %986 = vmatprep.subr.bf16.mxu0 %v1455_v35  ;;  %v561_v35 = vld [vmem:[#allocation6 + $0x58] sm:$0xff] }
  0xf2   : > { %987 = vmatpush1.bf16.msra.mxu0 %v1454_v36  ;;  %v565_v36 = vld [vmem:[#allocation6 + $0x78] sm:$0xff] }
  0xf3   : > { %988 = vmatprep.subr.bf16.mxu0 %v1463_v4  ;;  %v593_v4 = vld [vmem:[#allocation6 + $0x158] sm:$0xff] }
  0xf4   : > { %v1461_v9 = vcombine.high %v593_v4, %v597_v5 }
  0xf6   : > { %989 = vmatpush1.bf16.msra.mxu0 %v1462_v6 }
  0xf7   : > { %990 = vmatprep.subr.bf16.mxu0 %v1471_v12  ;;  %v601_v12 = vld [vmem:[#allocation6 + $0x198] sm:$0xff] }
  0xfa   : > { %991 = vmatpush1.bf16.msra.mxu0 %v1470_v14  ;;  %v1458_v14 = vcombine.low %v592_v2, %v596_v3 }
 0x1b0   : > { %v1496_v38 = vpop.f32.mrb[0].mxu0 }
 0x1b1   : > { %v457_v39 = vadd.f32 %v1496_v38, %v1404_v37  ;;  %v451_v40 = vpop.f32.mrb[1].mxu0 }
 0x1b2   : > { %v452_v41 = vadd.f32 %v1404_v37, %v451_v40  ;;  %v1427_v40 = vcombine.high %v560_v33, %v564_v34 }
 0x1b3   : > { %v461_v42 = vmax.f32 %v457_v39, 0.0 }
 0x1b4   : > { %v460_v45 = vmax.f32 %v452_v41, 0.0  ;;  %v1429_v41 = vcombine.high %v561_v35, %v565_v36 }
 0x1b6   : > { %v462_v46 = vpack.c.bf16 %v461_v42, %v460_v45  ;;  %v568_v42 = vld [vmem:[#allocation6 + $0x90] sm:$0xff]  ;;  %v573_v45 = vld [vmem:[#allocation6 + $0xb8] sm:$0xff] }
 0x1b7   : > { %v1435_v48 = vcombine.high %v568_v42, %v572_v43  ;;  %v1437_v49 = vcombine.high %v569_v44, %v573_v45 }
 0x1b8   : > { %1506 = vmatmul.mubr.msk.bf16.vlgmr.msra.gmra.mrb[0].mxu1 %vm502_vm3, %v462_v46  ;;  %v1426_v46 = vcombine.low %v560_v33, %v564_v34 }
 0x1b9   : > { %1020 = vmatpush1.bf16.msra.mxu1 %v1416_v17  ;;  %v552_v17 = vld [vmem:[#allocation6 + $0x10] sm:$0xff]  ;;  %1051 = vmatprep.mubr.bf16.mxu1 %v1749_v25 }
 0x1ba   : > { %1021 = vmatprep.subr.bf16.mxu1 %v1425_v47  ;;  %v1419_v20 = vcombine.high %v552_v17, %v556_v18  ;;  %v1418_v22 = vcombine.low %v552_v17, %v556_v18  ;;  %v1428_v47 = vcombine.low %v561_v35, %v565_v36  ;;  %v1469_v17 = vcombine.high %v601_v12, %v605_v13  ;;  %v608_v18 = vld [vmem:[#allocation6 + $0x1d0] sm:$0xff] }
 0x1bc   : > { %1062 = vmatprep.subr.bf16.mxu0 %v1419_v20  ;;  %v609_v20 = vld [vmem:[#allocation6 + $0x1d8] sm:$0xff] }
 0x1bd   : > { %1022 = vmatpush1.bf16.msra.mxu1 %v1424_v50  ;;  %v576_v50 = vld [vmem:[#allocation6 + $0xd0] sm:$0xff] }
 0x1be   : > { %1023 = vmatprep.subr.bf16.mxu1 %v1433_v51  ;;  %v580_v51 = vld [vmem:[#allocation6 + $0xf0] sm:$0xff] }
 0x1bf   : > { %v1443_v56 = vcombine.high %v576_v50, %v580_v51 }
 0x1c1   : > { %1024 = vmatpush1.bf16.msra.mxu1 %v1432_v54  ;;  %v1434_v54 = vcombine.low %v568_v42, %v572_v43 }
 0x1c2   : > { %1025 = vmatprep.subr.bf16.mxu1 %v1441_v55  ;;  %v1436_v55 = vcombine.low %v569_v44, %v573_v45 }
 0x1c5   : > { %1026 = vmatpush1.bf16.msra.mxu1 %v1440_v58  ;;  %v584_v58 = vld [vmem:[#allocation6 + $0x110] sm:$0xff] }
 0x1c6   : > { %1027 = vmatprep.subr.bf16.mxu1 %v1449_v59  ;;  %v588_v59 = vld [vmem:[#allocation6 + $0x130] sm:$0xff] }
 0x1c7   : > { %v1450_v6 = vcombine.low %v584_v58, %v588_v59 }
 0x1c9   : > { %1028 = vmatpush1.bf16.msra.mxu1 %v1448_v62  ;;  %v1442_v62 = vcombine.low %v576_v50, %v580_v51 }
 0x1ca   : > { %1029 = vmatprep.subr.bf16.mxu1 %v1457_v63  ;;  %v1444_v63 = vcombine.low %v577_v52, %v581_v53 }
 0x1cd   : > { %1030 = vmatpush1.bf16.msra.mxu1 %v1456_v0  ;;  %v1451_v0 = vcombine.high %v584_v58, %v588_v59 }
 0x1ce   : > { %1031 = vmatprep.subr.bf16.mxu1 %v1465_v8  ;;  %v1459_v8 = vcombine.high %v592_v2, %v596_v3 }
 0x1d1   : > { %1032 = vmatpush1.bf16.msra.mxu1 %v1464_v7  ;;  %v1452_v7 = vcombine.low %v585_v60, %v589_v61 }
 0x1d2   : > { %1033 = vmatprep.subr.bf16.mxu1 %v1473_v16  ;;  %v1467_v16 = vcombine.high %v600_v10, %v604_v11 }
 0x1d5   : > { %1034 = vmatpush1.bf16.msra.mxu1 %v1472_v15  ;;  %v1460_v15 = vcombine.low %v593_v4, %v597_v5 }
 0x1d6   : > { %1105 = vmatprep.subr.bf16.mxu1 %v1421_v24  ;;  %v1475_v24 = vcombine.high %v608_v18, %v612_v19 }
 0x28b   : > { %v540_v27 = vpop.f32.mrb[0].mxu1 }
 0x28c   : > { %v541_v28 = vadd.f32 %v1408_v26, %v540_v27  ;;  %v1507_v29 = vpop.f32.mrb[1].mxu1  ;;  %v1476_v27 = vcombine.low %v609_v20, %v613_v21 }
 0x28d   : > { %v543_v30 = vpop.f32.mrb[2].mxu1 }
 0x28e   : > { %v544_v31 = vadd.f32 %v1408_v26, %v543_v30  ;;  %v1508_v32 = vpop.f32.mrb[3].mxu1  ;;  %v547_v37 = vmax.f32 %v541_v28, 0.0  ;;  %v1474_v26 = vcombine.low %v608_v18, %v612_v19  ;;  %v616_v28 = vlaneseq }
 0x28f   : > { %v1949_v32 = vld [vmem:[%s2041_s6] sm:$0xff] }
 0x290   : > { %v548_v38 = vmax.f32 %v544_v31, 0.0  ;;  %v1942_v29 = vshrl.u32 %v616_v28, 7 }
 0x292   : > { %v1936_v39 = vpack.c.bf16 %v548_v38, %v547_v37  ;;  %v618_v30 = vsub.s32 0, %v1942_v29  ;;  %v626_v31 = vsub.s32 2, %v1942_v29  ;;  %v622_v33 = vsub.s32 1, %v1942_v29 }
 0x293   : > { %v630_v34 = vsub.s32 3, %v1942_v29 }
 0x294   : > { %1009 = vmatmul.mubr.bf16.vlgmr.msra.gmra.mrb[4].mxu0 %v1936_v39  ;;  %1052 = vmatmul.mubr.bf16.vlgmr.msra.gmra.mrb[4].mxu1 %v1936_v39  ;;  %v619_v35 = vrot.slane %v1949_v32, %v618_v30  ;;  %v627_v36 = vrot.slane %v1949_v32, %v626_v31  ;;  %v623_v37 = vrot.slane %v1949_v32, %v622_v33 }
 0x295   : > { %1063 = vmatpush1.bf16.msra.mxu0 %v1418_v22  ;;  %1106 = vmatpush1.bf16.msra.mxu1 %v1420_v23  ;;  %v1466_v22 = vcombine.low %v600_v10, %v604_v11  ;;  %v1468_v23 = vcombine.low %v601_v12, %v605_v13  ;;  %v631_v38 = vrot.slane %v1949_v32, %v630_v34  ;;  %v1750_v10 = vmov 1966171168  }
 0x296   : > { %1064 = vmatprep.subr.bf16.mxu0 %v1427_v40  ;;  %1107 = vmatprep.subr.bf16.mxu1 %v1429_v41  ;;  %v1234_v11 = vunpack.c.l.s4 %v1750_v10 }
 0x297   : > { %1094 = vmatprep.mubr.bf16.mxu0 %v1749_v25  ;;  %1137 = vmatprep.mubr.bf16.mxu1 %v1749_v25  ;;  %v1477_v25 = vcombine.high %v609_v20, %v613_v21 }
 0x298   : > { %v1235_v20 = vunpack.c.0.s8 %v1234_v11 }
 0x299   : > { %1065 = vmatpush1.bf16.msra.mxu0 %v1426_v46  ;;  %1108 = vmatpush1.bf16.msra.mxu1 %v1428_v47 }
 0x29a   : > { %1066 = vmatprep.subr.bf16.mxu0 %v1435_v48  ;;  %1109 = vmatprep.subr.bf16.mxu1 %v1437_v49  ;;  %v1958_v30 = vsub.s32 %v1235_v20, %v1942_v29 }
 0x29d   : > { %1067 = vmatpush1.bf16.msra.mxu0 %v1434_v54  ;;  %1110 = vmatpush1.bf16.msra.mxu1 %v1436_v55 }
 0x29e   : > { %1068 = vmatprep.subr.bf16.mxu0 %v1443_v56  ;;  %1111 = vmatprep.subr.bf16.mxu1 %v1445_v57 }
 0x2a1   : > { %1069 = vmatpush1.bf16.msra.mxu0 %v1442_v62  ;;  %1112 = vmatpush1.bf16.msra.mxu1 %v1444_v63 }
 0x2a2   : > { %1070 = vmatprep.subr.bf16.mxu0 %v1451_v0  ;;  %1113 = vmatprep.subr.bf16.mxu1 %v1453_v1 }
 0x2a5   : > { %1071 = vmatpush1.bf16.msra.mxu0 %v1450_v6  ;;  %1114 = vmatpush1.bf16.msra.mxu1 %v1452_v7 }
 0x2a6   : > { %1072 = vmatprep.subr.bf16.mxu0 %v1459_v8  ;;  %1115 = vmatprep.subr.bf16.mxu1 %v1461_v9 }
 0x2a9   : > { %1073 = vmatpush1.bf16.msra.mxu0 %v1458_v14  ;;  %1116 = vmatpush1.bf16.msra.mxu1 %v1460_v15 }
 0x2aa   : > { %1074 = vmatprep.subr.bf16.mxu0 %v1467_v16  ;;  %1117 = vmatprep.subr.bf16.mxu1 %v1469_v17 }
 0x2ad   : > { %1075 = vmatpush1.bf16.msra.mxu0 %v1466_v22  ;;  %1118 = vmatpush1.bf16.msra.mxu1 %v1468_v23 }
 0x2ae   : > { %1076 = vmatprep.subr.bf16.mxu0 %v1475_v24  ;;  %1119 = vmatprep.subr.bf16.mxu1 %v1477_v25 }
 0x2b1   : > { %1077 = vmatpush1.bf16.msra.mxu0 %v1474_v26  ;;  %1120 = vmatpush1.bf16.msra.mxu1 %v1476_v27 }
 0x2b4   : > { %1095 = vmatmul.mubr.bf16.vlgmr.msra.gmra.mrb[8].mxu0 %v1936_v39  ;;  %1138 = vmatmul.mubr.bf16.vlgmr.msra.gmra.mrb[8].mxu1 %v1936_v39 }
 0x367   : > { %v1010_v39 = vpop.f32.mrb[4].mxu0  ;;  %v1053_v40 = vpop.f32.mrb[4].mxu1 }
 0x368   : > { %v1011_v41 = vadd.f32 %v1010_v39, %v619_v35  ;;  %v1054_v42 = vadd.f32 %v1053_v40, %v627_v36  ;;  %v1012_v43 = vpop.f32.mrb[5].mxu0  ;;  %v1055_v44 = vpop.f32.mrb[5].mxu1  ;;  %v638_v39 = vsub.s32 5, %v1942_v29  ;;  %v646_v40 = vsub.s32 7, %v1942_v29 }
 0x369   : > { %v1013_v45 = vadd.f32 %v1012_v43, %v623_v37  ;;  %v1056_v46 = vadd.f32 %v1055_v44, %v631_v38  ;;  %v1014_v47 = vpop.f32.mrb[6].mxu0  ;;  %v1057_v48 = vpop.f32.mrb[6].mxu1 }
 0x36a   : > { %v1015_v49 = vadd.f32 %v1014_v47, %v619_v35  ;;  %v1058_v50 = vadd.f32 %v1057_v48, %v627_v36  ;;  %v1016_v51 = vpop.f32.mrb[7].mxu0  ;;  %v1059_v52 = vpop.f32.mrb[7].mxu1  ;;  %v1148_v55 = vmax.f32 %v1011_v41, 0.0  ;;  %v1150_v56 = vmax.f32 %v1054_v42, 0.0 }
 0x36b   : > { %v1017_v53 = vadd.f32 %v1016_v51, %v623_v37  ;;  %v1060_v54 = vadd.f32 %v1059_v52, %v631_v38  ;;  %v1149_v59 = vmax.f32 %v1013_v45, 0.0  ;;  %v1151_v60 = vmax.f32 %v1056_v46, 0.0 }
 0x36c   : > { %v1156_v57 = vmax.f32 %v1015_v49, 0.0  ;;  %v1158_v58 = vmax.f32 %v1058_v50, 0.0  ;;  %v634_v37 = vsub.s32 4, %v1942_v29  ;;  %v642_v38 = vsub.s32 6, %v1942_v29 }
 0x36d   : > { %v1157_v61 = vmax.f32 %v1017_v53, 0.0  ;;  %v1159_v62 = vmax.f32 %v1060_v54, 0.0  ;;  %v639_v44 = vrot.slane %v1949_v32, %v638_v39  ;;  %v647_v45 = vrot.slane %v1949_v32, %v646_v40 }
 0x36e   : > { %v1165_v63 = vmax.f32 %v1148_v55, %v1156_v57  ;;  %v1179_v0 = vmax.f32 %v1150_v56, %v1158_v58  ;;  %v635_v42 = vrot.slane %v1949_v32, %v634_v37  ;;  %v643_v43 = vrot.slane %v1949_v32, %v642_v38 }
 0x36f   : > { %v1172_v1 = vmax.f32 %v1149_v59, %v1157_v61  ;;  %v1186_v2 = vmax.f32 %v1151_v60, %v1159_v62 }
 0x370   : > { %v1166_v3 = vrot.slane %v1165_v63, 4  ;;  %v1180_v4 = vrot.slane %v1179_v0, 4 }
 0x371   : > { %v1173_v5 = vrot.slane %v1172_v1, 4  ;;  %v1187_v6 = vrot.slane %v1186_v2, 4 }
 0x372   : > { %v1167_v7 = vmax.f32 %v1165_v63, %v1166_v3  ;;  %v1181_v8 = vmax.f32 %v1179_v0, %v1180_v4 }
 0x373   : > { %v1174_v9 = vmax.f32 %v1172_v1, %v1173_v5  ;;  %v1188_v12 = vmax.f32 %v1186_v2, %v1187_v6 }
 0x374   : > { %v1168_v13 = vrot.slane %v1167_v7, 2  ;;  %v1182_v14 = vrot.slane %v1181_v8, 2 }
 0x375   : > { %v1175_v15 = vrot.slane %v1174_v9, 2  ;;  %v1189_v16 = vrot.slane %v1188_v12, 2 }
 0x376   : > { %v1169_v17 = vmax.f32 %v1167_v7, %v1168_v13  ;;  %v1183_v18 = vmax.f32 %v1181_v8, %v1182_v14 }
 0x377   : > { %v1176_v19 = vmax.f32 %v1174_v9, %v1175_v15  ;;  %v1190_v21 = vmax.f32 %v1188_v12, %v1189_v16 }
 0x378   : > { %v1170_v22 = vrot.slane %v1169_v17, 1  ;;  %v1184_v23 = vrot.slane %v1183_v18, 1 }
 0x379   : > { %v1177_v24 = vrot.slane %v1176_v19, 1  ;;  %v1191_v25 = vrot.slane %v1190_v21, 1 }
 0x37a   : > { %v1171_v26 = vmax.f32 %v1169_v17, %v1170_v22  ;;  %v1185_v27 = vmax.f32 %v1183_v18, %v1184_v23 }
 0x37b   : > { %v1178_v28 = vmax.f32 %v1176_v19, %v1177_v24  ;;  %v1192_v31 = vmax.f32 %v1190_v21, %v1191_v25 }
 0x37d   : > { %v1229_v33 = vcombine.low %v1171_v26, %v1178_v28  ;;  %v1230_v34 = vcombine.low %v1185_v27, %v1192_v31 }
 0x37f   : > { %v1961_v35 = vrot.slane %v1229_v33, %v1958_v30  ;;  %v1964_v36 = vrot.slane %v1230_v34, %v1958_v30 }
 0x381   : > { %v1261_v41 = vcombine.low %v1961_v35, %v1964_v36 }
 0x387   : > { %v1096_v46 = vpop.f32.mrb[8].mxu0  ;;  %v1139_v47 = vpop.f32.mrb[8].mxu1 }
 0x388   : > { %v1097_v48 = vadd.f32 %v1096_v46, %v635_v42  ;;  %v1140_v49 = vadd.f32 %v1139_v47, %v643_v43  ;;  %v1098_v50 = vpop.f32.mrb[9].mxu0  ;;  %v1141_v51 = vpop.f32.mrb[9].mxu1 }
 0x389   : > { %v1099_v52 = vadd.f32 %v1098_v50, %v639_v44  ;;  %v1142_v53 = vadd.f32 %v1141_v51, %v647_v45  ;;  %v1100_v29 = vpop.f32.mrb[10].mxu0  ;;  %v1143_v54 = vpop.f32.mrb[10].mxu1 }
 0x38a   : > { %v1101_v55 = vadd.f32 %v1100_v29, %v635_v42  ;;  %v1144_v56 = vadd.f32 %v1143_v54, %v643_v43  ;;  %v1102_v57 = vpop.f32.mrb[11].mxu0  ;;  %v1145_v58 = vpop.f32.mrb[11].mxu1  ;;  %v1152_v61 = vmax.f32 %v1097_v48, 0.0  ;;  %v1154_v62 = vmax.f32 %v1140_v49, 0.0 }
 0x38b   : > { %v1103_v59 = vadd.f32 %v1102_v57, %v639_v44  ;;  %v1146_v60 = vadd.f32 %v1145_v58, %v647_v45  ;;  %v1153_v0 = vmax.f32 %v1099_v52, 0.0  ;;  %v1155_v1 = vmax.f32 %v1142_v53, 0.0 }
 0x38c   : > { %v1160_v63 = vmax.f32 %v1101_v55, 0.0  ;;  %v1162_v32 = vmax.f32 %v1144_v56, 0.0  ;;  %v1269_v43 = vrot.slane %v1261_v41, %v1958_v30 }
 0x38d   : > { %v1161_v2 = vmax.f32 %v1103_v59, 0.0  ;;  %v1163_v3 = vmax.f32 %v1146_v60, 0.0 }
 0x38e   : > { %v1193_v4 = vmax.f32 %v1152_v61, %v1160_v63  ;;  %v1207_v5 = vmax.f32 %v1154_v62, %v1162_v32 }
 0x38f   : > { %v1200_v6 = vmax.f32 %v1153_v0, %v1161_v2  ;;  %v1214_v7 = vmax.f32 %v1155_v1, %v1163_v3 }
 0x390   : > { %v1194_v8 = vrot.slane %v1193_v4, 4  ;;  %v1208_v9 = vrot.slane %v1207_v5, 4 }
 0x391   : > { %v1201_v10 = vrot.slane %v1200_v6, 4  ;;  %v1215_v11 = vrot.slane %v1214_v7, 4 }
 0x392   : > { %v1195_v12 = vmax.f32 %v1193_v4, %v1194_v8  ;;  %v1209_v13 = vmax.f32 %v1207_v5, %v1208_v9 }
 0x393   : > { %v1202_v14 = vmax.f32 %v1200_v6, %v1201_v10  ;;  %v1216_v15 = vmax.f32 %v1214_v7, %v1215_v11 }
 0x394   : > { %v1196_v16 = vrot.slane %v1195_v12, 2  ;;  %v1210_v17 = vrot.slane %v1209_v13, 2 }
 0x395   : > { %v1203_v18 = vrot.slane %v1202_v14, 2  ;;  %v1217_v19 = vrot.slane %v1216_v15, 2 }
 0x396   : > { %v1197_v20 = vmax.f32 %v1195_v12, %v1196_v16  ;;  %v1211_v21 = vmax.f32 %v1209_v13, %v1210_v17 }
 0x397   : > { %v1204_v22 = vmax.f32 %v1202_v14, %v1203_v18  ;;  %v1218_v23 = vmax.f32 %v1216_v15, %v1217_v19 }
 0x398   : > { %v1198_v24 = vrot.slane %v1197_v20, 1  ;;  %v1212_v25 = vrot.slane %v1211_v21, 1 }
 0x399   : > { %v1205_v26 = vrot.slane %v1204_v22, 1  ;;  %v1219_v27 = vrot.slane %v1218_v23, 1 }
 0x39a   : > { %v1199_v28 = vmax.f32 %v1197_v20, %v1198_v24  ;;  %v1213_v31 = vmax.f32 %v1211_v21, %v1212_v25 }
 0x39b   : > { %v1206_v33 = vmax.f32 %v1204_v22, %v1205_v26  ;;  %v1220_v34 = vmax.f32 %v1218_v23, %v1219_v27 }
 0x39d   : > { %v1231_v37 = vcombine.low %v1199_v28, %v1206_v33  ;;  %v1232_v38 = vcombine.low %v1213_v31, %v1220_v34 }
 0x39f   : > { %v1253_v39 = vrot.slane %v1231_v37, %v1958_v30  ;;  %v1260_v40 = vrot.slane %v1232_v38, %v1958_v30 }
 0x3a1   : > { %v1262_v42 = vcombine.low %v1253_v39, %v1260_v40 }
 0x3a3   : > { %v1276_v44 = vrot.slane %v1262_v42, %v1958_v30 }
 0x3a5   : > { %v1277_v45 = vcombine.low %v1269_v43, %v1276_v44 }
 0x3a7   : > { %v1279_v46 = vmax.f32 %v1277_v45, 0.0 }
 0x3a9   : > { %1285 = vst [vmem:[%s319_s19] sm:$0xff] %v1279_v46 }
 0x3aa   : > { %1666 = shalt.err (!%p1663_p6)
}
 0x3ab   : > { %s1667_s17 = scalar_lea.hbm %s1988_s30, 128  ;;  %s1671_s28 = scalar_lea.hbm %s2042_s7, 256 }
 0x3ac   : > { %p1668_p7 = scmp.ne.s32.totalorder %s1988_s30, %s1667_s17  ;;  %p1672_p0 = scmp.lt.u32.totalorder %s1988_s30, %s2042_s7 }
 0x3ad   : > { %p1673_p1 = scmp.lt.u32.totalorder %s1671_s28, %s1667_s17  ;;  %p1675_p13 = scmp.lt.u32.totalorder %s1667_s17, %s1988_s30 }
 0x3ae   : > { %p1669_p9 = pnand %p1668_p7, %p2059_p8 }
 0x3af   : > { %p1674_p4 = por %p1673_p1, %p1672_p0 }
 0x3b0   : > { %p1670_p12 = pneg %p1669_p9 }
 0x3b1   : > { %p1676_p10 = por %p1675_p13, %p1674_p4 }
 0x3b3   : > { %p1677_p11 = pnand %p1676_p10, %p1670_p12 }
 0x3b5   : > { %1680 = shalt.err (!%p1677_p11)
}
 0x3b6   : > { %1517 = dma.vmem_to_hbm [thread:$0]  (%p2059_p8), %s1990_s21, 128, %s1988_s30, %s1287_s8  }
 0x3b7 PF: > { %p1534_p2 = scmp.ge.s32.totalorder %s1739_s29, 2  ;;  %s1313_s22 = sand.u32 1, %s1719_s24  }
 0x3b8   : > { %p2060_p3 = scmp.ne.s32.totalorder %s2052_s13, 0  ;;  %s1314_s19 = scalar_lea.sflag [#allocation5], %s1313_s22 }
 0x3ba   : > { %p1527_p5 = pnand %p1534_p2, %p2060_p3 }
 0x3bc   : > { %1714 = dma.done.wait (!%p1527_p5), %s1314_s19, 128  }
 0x3bd   : > { %1716 = vsyncadd (!%p1527_p5), %s1314_s19, 4294967168  ;;  %s22_s29 = sadd.s32 1, %s1739_s29   ;;  %s2061_s11 = sld [smem:[#allocation14_spill]] }
 0x3be   : > { %p19_p6 = scmp.ge.s32.totalorder %s22_s29, 4   ;;  %s2062_s27 = sld [smem:[#allocation12_spill]] }
 0x3bf   : > { %s2063_s28 = sld [smem:[#allocation13_spill]]  ;;  %s2064_s24 = smov %s1723_s25 }
 0x3c0   : > { %s2065_s25 = smov %s1727_s26  ;;  %21 = sbr.rel (!%p19_p6) target bundleno = 6 (0x6), region = 100 }
 0x3c3   : > { %s2066_s26 = smov %s2061_s11 }
 0x3c7   :  { %1319 = vsyncpa [#allocation4], 1 }
 0x3c8   :  { %1321 = vsyncpa [#allocation4 + $0x1], 1 }
 0x3c9   :  { %1322 = vsyncpa [#allocation7], 1 }
 0x3ca   :  { %1323 = vsyncpa [#allocation5], 1 }
 0x3cb   :  { %1325 = vsyncpa [#allocation5 + $0x1], 1 }

</bundles_post_ra>
